<compile_context>
chip_gen: v5e
topology: v5e:2x2
jax: 0.10.0
libtpu: 0.0.40
codegen_flags: <defaults>
</compile_context>

<pallas_src>
import jax
import jax.numpy as jnp
from jax import lax
from jax.experimental import pallas as pl
from jax.experimental.pallas import tpu as pltpu


TILE_M = 8192          # rows of x per grid step; sweep 2048-8192 per generation
SPLIT_THRESHOLD = 2048  # above this, force >=2 grid steps (v7x megacore)


def _round_up(x, m):
    return ((x + m - 1) // m) * m


def _tile_rows(batch, tile_m):
    """Pick the row-tile size for the batch dimension."""
    if batch <= SPLIT_THRESHOLD:
        # Single grid step; block == full array, so no (8,128) divisibility
        # constraints and no wasted launches for small batches.
        return batch
    # Large batch: tile with a multiple of 128 (lane-dense out^T, sublane-
    # aligned x) and keep at least 2 grid steps so both TensorCores get work.
    return min(tile_m, _round_up(pl.cdiv(batch, 2), 128))


def linear_classifier_kernel(x_ref, w_ref, b_ref, ot_ref):
    # x_ref: (tm, 128)   w_ref: (2, 128)   b_ref: (2, 1)   ot_ref: (2, tm)
    # out^T = W @ x^T  (contract K=128 on both operands), f32 accumulation.
    ot_ref[...] = (
        lax.dot_general(
            w_ref[...],
            x_ref[...],
            dimension_numbers=(((1,), (1,)), ((), ())),
            preferred_element_type=jnp.float32,
        )
        + b_ref[...]
    )


def linear_classifier_forward(x, w, b, *, tile_m=TILE_M):
    """x: (B, 128), w: (2, 128) [PyTorch nn.Linear layout], b: (2,) -> (B, 2) f32."""
    B, D_in = x.shape
    D_out, D_in_w = w.shape
    assert D_in == D_in_w, (D_in, D_in_w)

    b_col = b.reshape(D_out, 1)  # broadcast over the lane (batch) axis in-kernel

    tm = _tile_rows(B, tile_m)
    grid = (pl.cdiv(B, tm),)

    out_t = pl.pallas_call(
        linear_classifier_kernel,
        out_shape=jax.ShapeDtypeStruct((D_out, B), jnp.float32),
        grid_spec=pltpu.PrefetchScalarGridSpec(
            num_scalar_prefetch=0,
            grid=grid,
            in_specs=[
                pl.BlockSpec((tm, D_in), lambda i: (i, 0)),      # x batch tile
                pl.BlockSpec((D_out, D_in), lambda i: (0, 0)),   # W, resident
                pl.BlockSpec((D_out, 1), lambda i: (0, 0)),      # b, resident
            ],
            out_specs=pl.BlockSpec((D_out, tm), lambda i: (0, i)),  # lane-dense out^T
        ),
        compiler_params=pltpu.CompilerParams(
            dimension_semantics=("parallel",),
        ),
    )(x, w, b_col)

    # Cheap wrapper-side transpose back to the module's (B, 2) layout.
    return out_t.T


def init_params(key):
    # nn.Linear(128, 2) default init: uniform(-1/sqrt(fan_in), 1/sqrt(fan_in)),
    # weight stored in PyTorch layout (out_features, in_features) = (2, 128).
    k1, k2 = jax.random.split(key)
    bound = 1.0 / jnp.sqrt(128.0)
    w = jax.random.uniform(k1, (2, 128), jnp.float32, -bound, bound)
    b = jax.random.uniform(k2, (2,), jnp.float32, -bound, bound)
    return w, b


def reference_forward(x, w, b):
    return x @ w.T + b


if __name__ == "__main__":
    key = jax.random.PRNGKey(0)
    kx, kp = jax.random.split(key)

    # Small smoke-test batch (single grid step path).
    B = 8
    x = jax.random.normal(kx, (B, 128), jnp.float32)
    w, b = init_params(kp)

    out = linear_classifier_forward(x, w, b)
    out = jax.block_until_ready(out)

    ref = reference_forward(x, w, b)
    assert out.shape == (B, 2)
    assert jnp.allclose(out, ref, atol=1e-4, rtol=1e-4)

    # Also exercise the tiled path (multiple grid steps, non-multiple batch).
    B2 = 2048 + 300
    x2 = jax.random.normal(kx, (B2, 128), jnp.float32)
    out2 = jax.block_until_ready(linear_classifier_forward(x2, w, b))
    ref2 = reference_forward(x2, w, b)
    assert out2.shape == (B2, 2)
    assert jnp.allclose(out2, ref2, atol=1e-4, rtol=1e-4)

    print("KERNEL_OK")
</pallas_src>

<mosaic_0001>
module attributes {stable_mosaic.version = 11 : i64} {
  func.func @linear_classifier_kernel(%arg0: i32, %arg1: memref<8x128xf32, #tpu.memory_space<vmem>>, %arg2: memref<2x128xf32, #tpu.memory_space<vmem>>, %arg3: memref<2x1xf32, #tpu.memory_space<vmem>>, %arg4: memref<2x8xf32, #tpu.memory_space<vmem>>) attributes {dimension_semantics = [#tpu.dimension_semantics<parallel>], iteration_bounds = array<i64: 1>, scalar_prefetch = 0 : i64, scratch_operands = 0 : i64, tpu.core_type = #tpu.core_type<tc>, window_params = [{transform_indices = @transform_0, window_bounds = array<i64: 8, 128>}, {pipeline_mode = #tpu.pipeline_mode<synchronous>, transform_indices = @transform_1, window_bounds = array<i64: 2, 128>}, {pipeline_mode = #tpu.pipeline_mode<synchronous>, transform_indices = @transform_2, window_bounds = array<i64: 2, 1>}, {transform_indices = @transform_3, window_bounds = array<i64: 2, 8>}]} {
    %c0 = arith.constant 0 : index
    %c0_0 = arith.constant 0 : index
    %0 = vector.load %arg2[%c0, %c0_0] : memref<2x128xf32, #tpu.memory_space<vmem>>, vector<2x128xf32>
    %c0_1 = arith.constant 0 : index
    %c0_2 = arith.constant 0 : index
    %1 = vector.load %arg1[%c0_1, %c0_2] : memref<8x128xf32, #tpu.memory_space<vmem>>, vector<8x128xf32>
    %cst = arith.constant dense<0.000000e+00> : vector<2x8xf32>
    %2 = tpu.matmul %0, %1, %cst {dimension_numbers = #tpu.dot_dimension_numbers<[1], [1], [0], [0], [0, 0, 1, 0], [], []>} : vector<2x128xf32>, vector<8x128xf32>, vector<2x8xf32> -> vector<2x8xf32>
    %c0_3 = arith.constant 0 : index
    %c0_4 = arith.constant 0 : index
    %3 = vector.load %arg3[%c0_3, %c0_4] : memref<2x1xf32, #tpu.memory_space<vmem>>, vector<2x1xf32>
    %4 = vector.broadcast %3 : vector<2x1xf32> to vector<2x8xf32>
    %5 = arith.addf %2, %4 : vector<2x8xf32>
    %c0_5 = arith.constant 0 : index
    %c0_6 = arith.constant 0 : index
    %6 = vector.load %arg4[%c0_5, %c0_6] : memref<2x8xf32, #tpu.memory_space<vmem>>, vector<2x8xf32>
    tpu.vector_store %arg4[%c0_5, %c0_6], %5 {strides = array<i32>} : memref<2x8xf32, #tpu.memory_space<vmem>>, vector<2x8xf32>,
    return
  }
  func.func @transform_0(%arg0: i32) -> (i32, i32) {
    %c0_i32 = arith.constant 0 : i32
    %c0_i32_0 = arith.constant 0 : i32
    return %arg0, %c0_i32 : i32, i32
  }
  func.func @transform_1(%arg0: i32) -> (i32, i32) {
    %c0_i32 = arith.constant 0 : i32
    %c0_i32_0 = arith.constant 0 : i32
    %c0_i32_1 = arith.constant 0 : i32
    return %c0_i32, %c0_i32_0 : i32, i32
  }
  func.func @transform_2(%arg0: i32) -> (i32, i32) {
    %c0_i32 = arith.constant 0 : i32
    %c0_i32_0 = arith.constant 0 : i32
    %c0_i32_1 = arith.constant 0 : i32
    return %c0_i32, %c0_i32_0 : i32, i32
  }
  func.func @transform_3(%arg0: i32) -> (i32, i32) {
    %c0_i32 = arith.constant 0 : i32
    %c0_i32_0 = arith.constant 0 : i32
    return %c0_i32, %arg0 : i32, i32
  }
}

</mosaic_0001>

<bundles_post_ra>
// kernel: tpu_custom_call.1
= control target key start
LH: loop header
LB: loop body
LE: loop exit
PB: predicated region body
PF: predicated region fallthrough
CT: control target
= control target key end

     0   :  { %8 = vsyncpa [#allocation3], 0  ;;  %s167_s0 = inlined_call_operand.hbm [shape: f32[8,128], index: 0, kind: input, shape index: {}]   ;;  %s168_s1 = inlined_call_operand.vmem [shape: f32[2,128], index: 1, kind: input, shape index: {}]   ;;  %s169_s2 = inlined_call_operand.vmem [shape: f32[2,1], index: 2, kind: input, shape index: {}]   ;;  %s170_s3 = inlined_call_operand.hbm [shape: f32[2,8], index: 3, kind: output, shape index: {}]  }
   0x1   :  { %9 = vsyncpa [#allocation4], 0  ;;  %s15_s14 = sshll.u32 %s167_s0, 4  ;;  %s132_s15 = smov [#allocation2]   ;;  %s16_s14 = int_to_ptr.hbm [resolvable:$true] %s15_s14 }
   0x2   :  { %s17_s16 = sshll.u32 %s132_s15, 4  ;;  %s18_s16 = int_to_ptr.vmem [resolvable:$true] %s17_s16 }
   0x3   :  { %20 = dma.hbm_to_vmem [thread:$0]  %s16_s14, 128, %s18_s16, [#allocation3]  }
   0x4   :  { %128 = dma.done.wait [#allocation3], 128  }
   0x5   :  { %129 = vsyncadd [#allocation3], 4294967168  ;;  %v133_v0 = vmov 0   ;;  %v30_v1 = vld [vmem:[#allocation2] sm:$0xff]  ;;  %s134_s0 = smov [#allocation5]   ;;  %s66_s24 = sshll.u32 %s170_s3, 4  ;;  %s67_s24 = int_to_ptr.hbm [resolvable:$true] %s66_s24 }
   0x6   :  { %79 = vset.pattern.permute.xlu0 %v133_v0  ;;  %v31_v2 = vld [vmem:[%s169_s2] sm:$0x3]  ;;  %52 = vmatpush.xpose.msra.mxu0 %v30_v1  ;;  %s64_s21 = sshll.u32 %s134_s0, 4  ;;  %vm57_vm0 = vcmask 58368   ;;  %s65_s21 = int_to_ptr.vmem [resolvable:$true] %s64_s21 }
   0x7   :  { %v29_v3 = vld [vmem:[%s168_s1] sm:$0x3]  ;;  %34 = vperm.xlu0 %79, %v31_v2  }
   0x9   :  { %53 = vmatmul.f32.vlgmr.msra.gmra.mxu0 %v29_v3 }
  0x79   :  { %v35_v4 = vpop.permute.xlu0 %34 }
  0x86   :  { %v54_v5 = vpop.f32.mrf.mxu0 }
  0x87   :  { %v55_v6 = vadd.f32 %v54_v5, %v35_v4 }
  0x89   :  { %58 = vst.msk [vmem:[#allocation5] sm:$0x3] %vm57_vm0, %v55_v6 }
  0x8a   :  { %69 = dma.vmem_to_hbm [thread:$0]  %s65_s21, 32, %s67_s24, [#allocation4]  }
  0x8b   :  { %130 = dma.done.wait [#allocation4], 32  }
  0x8c   :  { %131 = vsyncadd [#allocation4], 4294967264 }
  0x8d   :  { %74 = vsyncpa [#allocation3], 1 }
  0x8e   :  { %75 = vsyncpa [#allocation4], 1 }

</bundles_post_ra>
